<compile_context>
chip_gen: v7x
topology: tpu7x:2x2x1
jax: 0.10.0
libtpu: 0.0.40
codegen_flags: <defaults>
</compile_context>

<pallas_src>
import functools
import math

import jax
import jax.numpy as jnp
from jax.experimental import pallas as pl
from jax.experimental.pallas import tpu as pltpu

# 48 MB scoped VMEM: below v7x's 64 MiB physical per-TC VMEM, far above the
# worst-case double-buffered footprint of any call in this network (~20 MB).
_VMEM_LIMIT = 48 * 1024 * 1024

_STAGES = ((64, 3, 1, 1), (128, 4, 2, 1), (256, 6, 1, 2), (512, 3, 1, 4))


def _round_up(x, m):
    return (x + m - 1) // m * m


# ---------------------------------------------------------------------------
# Kernel 1: matmul + bias (+ fused residual) (+ ReLU).
#   Full-K single-step dot (K <= 2048 in this network), full(ish)-width N so
#   the activation strip is read from HBM exactly once.  bf16 MXU operands,
#   f32 epilogue (v5e has no bf16 VPU), bf16 store.
# ---------------------------------------------------------------------------
def _mm_bias_kernel(relu, has_res, *refs):
    if has_res:
        a_ref, w_ref, b_ref, r_ref, o_ref = refs
    else:
        a_ref, w_ref, b_ref, o_ref = refs
        r_ref = None
    y = jnp.dot(a_ref[...], w_ref[...], preferred_element_type=jnp.float32)
    y = y + b_ref[...]
    if has_res:
        y = y + r_ref[...].astype(jnp.float32)
    if relu:
        y = jnp.maximum(y, 0.0)
    o_ref[...] = y.astype(o_ref.dtype)


def _pick_tiles(M, Ncp):
    """Choose (TM, TN, Mp).  Full-width N (activation read once); split N or M
    in two only when the grid would collapse to a single parallel tile so that
    v7x's two TensorCores both get work."""
    TM = None
    for t in (512, 256, 128, 64, 32):
        if M % t == 0:
            TM = t
            break
    if TM is None:
        if M <= 1024:
            TM = M                    # full-dim block, no padding needed
        else:
            TM = 256                  # rare fallback: pad M up (not hit here)
    Mp = _round_up(M, TM)
    if Mp // TM == 1:
        if Ncp % 256 == 0:
            return TM, Ncp // 2, Mp
        if M % 16 == 0 and M >= 32:
            return M // 2, Ncp, Mp
    return TM, Ncp, Mp


@functools.partial(jax.jit, static_argnames=("relu",))
def matmul_bias_act(patches, w2, bias, residual=None, *, relu):
    """(M,K) bf16 @ (Kw,Ncp) bf16 + per-column bias [+residual] [+ReLU]."""
    M, K = patches.shape
    Kw, Ncp = w2.shape
    if Kw != K:                       # only the 7x7 stem (K = 147 -> 256)
        patches = jnp.pad(patches, ((0, 0), (0, Kw - K)))
        K = Kw

    TM, TN, Mp = _pick_tiles(M, Ncp)
    if Mp != M:                       # never triggered in this network
        patches = jnp.pad(patches, ((0, Mp - M), (0, 0)))

    has_res = residual is not None
    in_specs = [
        pl.BlockSpec((TM, K), lambda i, j: (i, 0)),
        pl.BlockSpec((K, TN), lambda i, j: (0, j)),
        pl.BlockSpec((1, TN), lambda i, j: (0, j)),
    ]
    args = [patches, w2, bias]
    if has_res:
        r = residual
        if r.shape != (Mp, Ncp):
            r = jnp.pad(r, ((0, Mp - r.shape[0]), (0, 0)))
        in_specs.append(pl.BlockSpec((TM, TN), lambda i, j: (i, j)))
        args.append(r)

    out = pl.pallas_call(
        functools.partial(_mm_bias_kernel, relu, has_res),
        out_shape=jax.ShapeDtypeStruct((Mp, Ncp), jnp.bfloat16),
        grid=(Mp // TM, Ncp // TN),
        in_specs=in_specs,
        out_specs=pl.BlockSpec((TM, TN), lambda i, j: (i, j)),
        compiler_params=pltpu.CompilerParams(
            dimension_semantics=("parallel", "parallel"),
            vmem_limit_bytes=_VMEM_LIMIT),
    )(*args)
    return out if Mp == M else out[:M]


# ---------------------------------------------------------------------------
# Kernel 2: direct (tap-decomposed) stride-1 3x3 conv + bias + ReLU.
#   One whole image per grid step (grid over batch only, Cout kept full-width
#   since Cout <= 512 for these layers):
#     1. build the spatially zero-padded image in a VMEM scratch (no HBM pad),
#     2. accumulate 9 tap matmuls whose LHS are contiguous row windows of the
#        flattened padded image (M = Ho*Wp rows -> MXU well fed),
#     3. epilogue + width compaction (drop the Wp-Wo junk columns) row by row.
#   The activation is read from HBM exactly once per image.
# ---------------------------------------------------------------------------
def _conv3x3_kernel(p, d, H, W, Ho, Wo, relu,
                    x_ref, w_ref, b_ref, o_ref, xp_ref, acc_ref):
    C = x_ref.shape[-1]
    Wp = W + 2 * p
    Mf = Ho * Wp

    # Spatially padded image in VMEM.  (Re-done every step so it is correct
    # under megacore sharding of the batch axis; it is a cheap VMEM-only fill.)
    xp_ref[...] = jnp.zeros_like(xp_ref)
    for h in range(H):                                   # static row copies
        dst = (h + p) * Wp + p
        xp_ref[dst:dst + W, :] = x_ref[0, h * W:(h + 1) * W, :]

    # 9 tap matmuls accumulated in f32.
    # TODO(synk): tap windows start at non-multiple-of-8 sublane offsets; an
    # XLU-roll based variant could avoid the unaligned loads (minor win).
    for t in range(9):
        i, j = divmod(t, 3)
        start = (i * Wp + j) * d
        part = jnp.dot(xp_ref[start:start + Mf, :],
                       w_ref[t * C:(t + 1) * C, :],
                       preferred_element_type=jnp.float32)
        if t == 0:
            acc_ref[...] = part
        else:
            acc_ref[...] += part

    # Epilogue + compaction Wp -> Wo (junk columns are never written out).
    bias = b_ref[...]
    for h in range(Ho):
        y = acc_ref[h * Wp:h * Wp + Wo, :] + bias
        if relu:
            y = jnp.maximum(y, 0.0)
        o_ref[0, h * Wo:(h + 1) * Wo, :] = y.astype(o_ref.dtype)


@functools.partial(jax.jit, static_argnames=("dilation", "padding", "relu"))
def conv3x3_direct(x, w2, bias, *, dilation, padding, relu=True):
    N, H, W, C = x.shape
    d, p = dilation, padding
    Ho = H + 2 * p - 2 * d
    Wo = W + 2 * p - 2 * d
    Hp, Wp = H + 2 * p, W + 2 * p
    K9, Ncp = w2.shape
    assert K9 == 9 * C, (K9, C)

    xf = x.reshape(N, H * W, C)                          # free reshape

    out = pl.pallas_call(
        functools.partial(_conv3x3_kernel, p, d, H, W, Ho, Wo, relu),
        out_shape=jax.ShapeDtypeStruct((N, Ho * Wo, Ncp), jnp.bfloat16),
        grid=(N,),
        in_specs=[pl.BlockSpec((1, H * W, C), lambda n: (n, 0, 0)),
                  pl.BlockSpec((K9, Ncp), lambda n: (0, 0)),
                  pl.BlockSpec((1, Ncp), lambda n: (0, 0))],
        out_specs=pl.BlockSpec((1, Ho * Wo, Ncp), lambda n: (n, 0, 0)),
        scratch_shapes=[
            # padded image ( +1 extra row so the last tap's contiguous window
            # stays in bounds; the extra rows only feed discarded columns)
            pltpu.VMEM(((Hp + 1) * Wp, C), jnp.bfloat16),
            pltpu.VMEM((Ho * Wp, Ncp), jnp.float32),     # f32 accumulator
        ],
        compiler_params=pltpu.CompilerParams(
            dimension_semantics=("parallel",),
            vmem_limit_bytes=_VMEM_LIMIT),
    )(xf, w2, bias)
    return out.reshape(N, Ho, Wo, Ncp)                   # free reshape


# ---------------------------------------------------------------------------
# Plain-JAX glue: im2col (stem + the single stride-2 3x3 only), maxpool,
# conv dispatcher.
# ---------------------------------------------------------------------------
def im2col(x, kh, kw, stride, dilation, padding):
    N, H, W, C = x.shape
    if padding > 0:
        x = jnp.pad(x, ((0, 0), (padding, padding), (padding, padding), (0, 0)))
    Ho = (H + 2 * padding - dilation * (kh - 1) - 1) // stride + 1
    Wo = (W + 2 * padding - dilation * (kw - 1) - 1) // stride + 1
    cols = []
    for i in range(kh):
        hi = i * dilation
        for j in range(kw):
            wj = j * dilation
            cols.append(x[:, hi:hi + stride * (Ho - 1) + 1:stride,
                            wj:wj + stride * (Wo - 1) + 1:stride, :])
    cols = jnp.concatenate(cols, axis=-1)
    return cols.reshape(N * Ho * Wo, kh * kw * C), (N, Ho, Wo)


def conv_bn(x, prm, *, kh, kw, stride=1, dilation=1, padding=0,
            relu=False, residual=None):
    """Conv2d(bias=False) + folded BatchNorm2d [+ fused residual] [+ ReLU]."""
    if kh == 3 and kw == 3 and stride == 1 and residual is None:
        return conv3x3_direct(x, prm["w2"], prm["bias"],
                              dilation=dilation, padding=padding, relu=relu)
    if kh == 1 and kw == 1:
        if stride > 1:
            x = x[:, ::stride, ::stride, :]
        N, Ho, Wo, C = x.shape
        patches = x.reshape(N * Ho * Wo, C)
    else:
        patches, (N, Ho, Wo) = im2col(x, kh, kw, stride, dilation, padding)
    res2d = None
    if residual is not None:
        res2d = residual.reshape(N * Ho * Wo, residual.shape[-1])
    out = matmul_bias_act(patches, prm["w2"], prm["bias"], res2d, relu=relu)
    return out.reshape(N, Ho, Wo, out.shape[-1])


def maxpool_3x3_s2(x):  # NHWC, kernel 3, stride 2, padding 1
    # TODO(synk): plain-JAX reduce_window; a Pallas maxpool adds little here.
    return jax.lax.reduce_window(
        x, jnp.array(-jnp.inf, x.dtype), jax.lax.max,
        window_dimensions=(1, 3, 3, 1), window_strides=(1, 2, 2, 1),
        padding=((0, 0), (1, 1), (1, 1), (0, 0)))


# ---------------------------------------------------------------------------
# Parameter init (synthetic, deterministic).  Weights are reshaped, channel-
# padded to multiples of 128, BN scale folded in, and cast to bf16 at init.
# Padded output channels have zero weights and zero bias, so they stay exactly
# zero through the whole network and never need slicing.
# ---------------------------------------------------------------------------
def _init_conv_bn(key, kh, kw, cin, cout, *, cin_pad):
    cout_p = _round_up(cout, 128)
    fan = kh * kw * cin
    w = jax.random.normal(key, (kh, kw, cin, cout), jnp.float32) * math.sqrt(2.0 / fan)
    wp = jnp.zeros((kh, kw, cin_pad, cout_p), jnp.float32).at[:, :, :cin, :cout].set(w)
    K = kh * kw * cin_pad
    w2 = wp.reshape(K, cout_p)
    # Fresh (inference-form) BatchNorm: scale folded into the weights, bias
    # kept as the only epilogue operand (per review).
    gamma = jnp.ones((cout,), jnp.float32)
    beta = jnp.zeros((cout,), jnp.float32)
    mean = jnp.zeros((cout,), jnp.float32)
    var = jnp.ones((cout,), jnp.float32)
    scale = gamma * jax.lax.rsqrt(var + 1e-5)
    bias = beta - mean * scale
    scale_p = jnp.zeros((cout_p,), jnp.float32).at[:cout].set(scale)
    bias_p = jnp.zeros((1, cout_p), jnp.float32).at[0, :cout].set(bias)
    w2 = w2 * scale_p[None, :]
    if K % 128 != 0:                    # only the 7x7 stem (K = 147 -> 256)
        w2 = jnp.pad(w2, ((0, _round_up(K, 128) - K), (0, 0)))
    return {"w2": w2.astype(jnp.bfloat16), "bias": bias_p}


def init_skip_resnet50(key, n_in=3):
    keys = iter(jax.random.split(key, 256))
    params = {"stem": _init_conv_bn(next(keys), 7, 7, n_in, 64, cin_pad=n_in)}
    # ResNet(Bottleneck, [3,4,6,3], strides=[1,2,1,1], dilations=[1,1,2,4])
    inplanes = 64
    layers = []
    for planes, blocks, stride, dilation in _STAGES:
        blk_list = []
        for b in range(blocks):
            s = stride if b == 0 else 1
            inp_p = _round_up(inplanes, 128)
            pln_p = _round_up(planes, 128)
            blk = {
                "stride": s, "dilation": dilation,
                "conv1": _init_conv_bn(next(keys), 1, 1, inplanes, planes,
                                       cin_pad=inp_p),
                "conv2": _init_conv_bn(next(keys), 3, 3, planes, planes,
                                       cin_pad=pln_p),
                "conv3": _init_conv_bn(next(keys), 1, 1, planes, planes * 4,
                                       cin_pad=pln_p),
            }
            if b == 0 and (s != 1 or inplanes != planes * 4):
                blk["down"] = _init_conv_bn(next(keys), 1, 1, inplanes,
                                            planes * 4, cin_pad=inp_p)
            blk_list.append(blk)
            inplanes = planes * 4
        layers.append(blk_list)
    params["layers"] = layers
    return params


# ---------------------------------------------------------------------------
# Forward pass
# ---------------------------------------------------------------------------
def bottleneck(x, blk):
    s, d = blk["stride"], blk["dilation"]
    out = conv_bn(x, blk["conv1"], kh=1, kw=1, relu=True)
    out = conv_bn(out, blk["conv2"], kh=3, kw=3, stride=s, dilation=d,
                  padding=d, relu=True)
    if "down" in blk:
        identity = conv_bn(x, blk["down"], kh=1, kw=1, stride=s, relu=False)
    else:
        identity = x
    # conv3: 1x1 + bias with the residual add and the final ReLU fused in-kernel.
    return conv_bn(out, blk["conv3"], kh=1, kw=1, relu=True, residual=identity)


def skip_resnet50_forward(params, x_nchw, init_control):
    """Equivalent of SkipResnet50.forward(x, init_control) -> layer5_f."""
    # TODO(synk): init_control is accepted but unused — it is consumed inside
    # the (unavailable) ResNet of resnet_GCN_skip.py whose skip-concat head
    # cannot be reproduced from the provided source.
    del init_control
    x = jnp.transpose(x_nchw, (0, 2, 3, 1)).astype(jnp.bfloat16)   # NCHW->NHWC
    x = conv_bn(x, params["stem"], kh=7, kw=7, stride=2, padding=3, relu=True)
    x = maxpool_3x3_s2(x)
    for blk_list in params["layers"]:
        for blk in blk_list:
            x = bottleneck(x, blk)
    return jnp.transpose(x, (0, 3, 1, 2)).astype(jnp.float32)      # NHWC->NCHW


# ---------------------------------------------------------------------------
if __name__ == "__main__":
    key = jax.random.PRNGKey(0)
    k_param, k_x, k_c = jax.random.split(key, 3)

    params = init_skip_resnet50(k_param, n_in=3)

    # Small deterministic inputs consistent with the module (NCHW image + control map).
    x = jax.random.normal(k_x, (2, 3, 16, 16), jnp.float32)
    init_control = jax.random.normal(k_c, (2, 1, 16, 16), jnp.float32)

    out = skip_resnet50_forward(params, x, init_control)
    out = jax.block_until_ready(out)

    assert out.shape == (2, 2048, 2, 2), out.shape
    assert bool(jnp.all(jnp.isfinite(out)))
    print("KERNEL_OK")
</pallas_src>

<mosaic_0001>
module attributes {stable_mosaic.version = 11 : i64} {
  func.func @_mm_bias_kernel(%arg0: i32, %arg1: i32, %arg2: memref<64x256xbf16, #tpu.memory_space<vmem>>, %arg3: memref<256x128xbf16, #tpu.memory_space<vmem>>, %arg4: memref<1x128xf32, #tpu.memory_space<vmem>>, %arg5: memref<64x128xbf16, #tpu.memory_space<vmem>>) attributes {dimension_semantics = [#tpu.dimension_semantics<parallel>, #tpu.dimension_semantics<parallel>], iteration_bounds = array<i64: 2, 1>, scalar_prefetch = 0 : i64, scratch_operands = 0 : i64, tpu.core_type = #tpu.core_type<tc>, window_params = [{transform_indices = @transform_0, window_bounds = array<i64: 64, 256>}, {transform_indices = @transform_1, window_bounds = array<i64: 256, 128>}, {transform_indices = @transform_2, window_bounds = array<i64: 1, 128>}, {transform_indices = @transform_3, window_bounds = array<i64: 64, 128>}]} {
    %c0 = arith.constant 0 : index
    %c0_0 = arith.constant 0 : index
    %0 = vector.load %arg2[%c0, %c0_0] : memref<64x256xbf16, #tpu.memory_space<vmem>>, vector<64x256xbf16>
    %c0_1 = arith.constant 0 : index
    %c0_2 = arith.constant 0 : index
    %1 = vector.load %arg3[%c0_1, %c0_2] : memref<256x128xbf16, #tpu.memory_space<vmem>>, vector<256x128xbf16>
    %cst = arith.constant dense<0.000000e+00> : vector<64x128xf32>
    %2 = tpu.matmul %0, %1, %cst {dimension_numbers = #tpu.dot_dimension_numbers<[1], [0], [0], [1], [0, 0, 1, 1], [], []>} : vector<64x256xbf16>, vector<256x128xbf16>, vector<64x128xf32> -> vector<64x128xf32>
    %c0_3 = arith.constant 0 : index
    %c0_4 = arith.constant 0 : index
    %3 = vector.load %arg4[%c0_3, %c0_4] : memref<1x128xf32, #tpu.memory_space<vmem>>, vector<1x128xf32>
    %4 = vector.broadcast %3 : vector<1x128xf32> to vector<64x128xf32>
    %5 = arith.addf %2, %4 : vector<64x128xf32>
    %cst_5 = arith.constant 0.000000e+00 : f32
    %6 = vector.broadcast %cst_5 : f32 to vector<64x128xf32>
    %7 = arith.maximumf %5, %6 : vector<64x128xf32>
    %8 = arith.truncf %7 : vector<64x128xf32> to vector<64x128xbf16>
    %c0_6 = arith.constant 0 : index
    %c0_7 = arith.constant 0 : index
    %9 = vector.load %arg5[%c0_6, %c0_7] : memref<64x128xbf16, #tpu.memory_space<vmem>>, vector<64x128xbf16>
    tpu.vector_store %arg5[%c0_6, %c0_7], %8 {strides = array<i32>} : memref<64x128xbf16, #tpu.memory_space<vmem>>, vector<64x128xbf16>,
    return
  }
  func.func @transform_0(%arg0: i32, %arg1: i32) -> (i32, i32) {
    %c0_i32 = arith.constant 0 : i32
    %c0_i32_0 = arith.constant 0 : i32
    return %arg0, %c0_i32 : i32, i32
  }
  func.func @transform_1(%arg0: i32, %arg1: i32) -> (i32, i32) {
    %c0_i32 = arith.constant 0 : i32
    %c0_i32_0 = arith.constant 0 : i32
    return %c0_i32, %arg1 : i32, i32
  }
  func.func @transform_2(%arg0: i32, %arg1: i32) -> (i32, i32) {
    %c0_i32 = arith.constant 0 : i32
    %c0_i32_0 = arith.constant 0 : i32
    return %c0_i32, %arg1 : i32, i32
  }
  func.func @transform_3(%arg0: i32, %arg1: i32) -> (i32, i32) {
    %c0_i32 = arith.constant 0 : i32
    return %arg0, %arg1 : i32, i32
  }
}

</mosaic_0001>

<bundles_post_ra>
// kernel: matmul_bias_act.1
= control target key start
LH: loop header
LB: loop body
LE: loop exit
PB: predicated region body
PF: predicated region fallthrough
CT: control target
= control target key end

     0   :  { %8 = vsyncpa [#allocation3], 0  ;;  %s1136_s0 = inlined_call_operand.vmem [shape: bf16[128,256], index: 0, kind: input, shape index: {}]   ;;  %s1137_s1 = inlined_call_operand.vmem [shape: bf16[256,128], index: 1, kind: input, shape index: {}]   ;;  %s1138_s2 = inlined_call_operand.vmem [shape: f32[1,128], index: 2, kind: input, shape index: {}]   ;;  %s1139_s3 = inlined_call_operand.hbm [shape: bf16[128,128], index: 3, kind: output, shape index: {}]  }
   0x1   :  { %10 = vsyncpa [#allocation3 + $0x1], 0  ;;  %s957_s12 = smov 0   ;;  %s959_s13 = smov 0  }
   0x2   :  { %s961_s14 = smov 0   ;;  %s963_s15 = smov 0  }
   0x3   :  { %s965_s16 = smov 0   ;;  %s967_s17 = smov 0  }
   0x4 LB: > { %s631_s18 = sadd.s32 4294967295, %s932_s17   ;;  %s632_s19 = sadd.s32 4294967294, %s932_s17   ;;  %s932_s17 = sphi %s967_s17, %s16_s17   ;;  %s928_s16 = sphi %s965_s16, %s1146_s16   ;;  %s924_s15 = sphi %s963_s15, %s1145_s15   ;;  %s920_s14 = sphi %s961_s14, %s1144_s14   ;;  %s916_s13 = sphi %s959_s13, %s1143_s13   ;;  %s912_s12 = sphi %s957_s12, %s1142_s12  }
   0x5   : > { %s28_s20 = sadd.s32 1, %s928_s16  ;;  %s115_s21 = sadd.s32 1, %s920_s14 }
   0x6   : > { %p30_p0 = scmp.ge.s32.totalorder %s28_s20, 2  ;;  %p125_p1 = scmp.ne.s32.totalorder %s920_s14, %s916_s13 }
   0x7   : > { %p126_p2 = scmp.eq.s32.totalorder %s631_s18, 1  ;;  %p131_p3 = scmp.ne.s32.totalorder %s916_s13, %s912_s12 }
   0x8   : > { %s1148_s20 = smov (%p30_p0, %s28_s20), 0  ;;  %p132_p5 = scmp.eq.s32.totalorder %s632_s19, 1 }
   0x9   : > { %p997_p4 = por %p126_p2, %p125_p1  ;;  %s110_s23 = ssub.s32 %s928_s16, %s1148_s20 }
   0xa   : > { %p637_p6 = scmp.ge.s32.totalorder %s932_s17, 1  ;;  %p113_p7 = scmp.eq.s32.totalorder %s110_s23, 0 }
   0xb   : > { %p1004_p8 = por %p132_p5, %p131_p3  ;;  %p173_p9 = scmp.lt.s32.totalorder %s932_s17, 3 }
   0xc   : > { %s1010_s25 = scalar_select %p113_p7, %s920_s14, %s115_s21  }
   0xd   : > { %p174_p10 = pnand %p637_p6, %p173_p9 }
   0xe   : > { %v826_v0 = vld [vmem:[%s1137_s1 + $0x40] sm:$0xff] (!%p174_p10)   ;;  %s639_s28 = sshll.u32 (!%p174_p10), %s924_s15, 3  ;;  %v828_v2 = vld [vmem:[%s1137_s1 + $0x48] sm:$0xff] (!%p174_p10)   ;;  %v830_v4 = vld [vmem:[%s1137_s1 + $0x50] sm:$0xff] (!%p174_p10)   ;;  %s202_s6 = sand.u32 (!%p174_p10), 1, %s916_s13  }
   0xf   : > { %177 = sbr.rel (%p174_p10) target bundleno = 294 (0x126), region = 32  ;;  %v827_v1 = vld [vmem:[%s1137_s1] sm:$0xff] (!%p174_p10)   ;;  %713 = vmatprep.subr.bf16.mxu0 (!%p174_p10), %v826_v0  ;;  %753 = vmatprep.subr.bf16.mxu1 (!%p174_p10), %v826_v0  ;;  %v829_v3 = vld [vmem:[%s1137_s1 + $0x8] sm:$0xff] (!%p174_p10)   ;;  %p206_p11 = scmp.lt.s32.totalorder (!%p174_p10), %s639_s28, 15  ;;  %v831_v5 = vld [vmem:[%s1137_s1 + $0x10] sm:$0xff] (!%p174_p10)  }
  0x10   : > { %714 = vmatpush3.bf16.msra.mxu0 (!%p174_p10), %v827_v1  ;;  %761 = vmatpush3.bf16.msra.mxu1 (!%p174_p10), %v827_v1  ;;  %v832_v6 = vld [vmem:[%s1137_s1 + $0x58] sm:$0xff] (!%p174_p10)   ;;  %v834_v8 = vld [vmem:[%s1137_s1 + $0x60] sm:$0xff] (!%p174_p10)   ;;  %v836_v10 = vld [vmem:[%s1137_s1 + $0x68] sm:$0xff] (!%p174_p10)   ;;  %s689_s8 = sshll.u32 (!%p174_p10), %s924_s15, 9  ;;  %s1090_s15 = scalar_lea.sflag (!%p174_p10), [#allocation3], %s202_s6 }
  0x11   : > { %715 = vmatprep.subr.bf16.mxu0 (!%p174_p10), %v828_v2  ;;  %754 = vmatprep.subr.bf16.mxu1 (!%p174_p10), %v828_v2  ;;  %v833_v7 = vld [vmem:[%s1137_s1 + $0x18] sm:$0xff] (!%p174_p10)   ;;  %v835_v9 = vld [vmem:[%s1137_s1 + $0x20] sm:$0xff] (!%p174_p10)   ;;  %v837_v13 = vld [vmem:[%s1137_s1 + $0x28] sm:$0xff] (!%p174_p10)   ;;  %s1084_s11 = scalar_lea.hbm (!%p174_p10), %s1139_s3, %s689_s8  ;;  %s934_s19 = smov (!%p174_p10), [#allocation2]  }
  0x12   : > { %v838_v14 = vld [vmem:[%s1137_s1 + $0x70] sm:$0xff] (!%p174_p10)   ;;  %v840_v16 = vld [vmem:[%s1137_s1 + $0x78] sm:$0xff] (!%p174_p10)   ;;  %v642_v26 = vld [vmem:[%s1138_s2] ss:$0 sm:$0xff] (!%p174_p10)  ;;  %s858_s21 = sshll.u32 (!%p174_p10), %s934_s19, 4  ;;  %s859_s21 = int_to_ptr.vmem [resolvable:$false] %s858_s21 }
  0x13   : > { %v839_v15 = vld [vmem:[%s1137_s1 + $0x30] sm:$0xff] (!%p174_p10)   ;;  %v841_v17 = vld [vmem:[%s1137_s1 + $0x38] sm:$0xff] (!%p174_p10)   ;;  %s860_s23 = scalar_lea.vmem (!%p174_p10), %s859_s21, 1024 }
  0x14   : > { %716 = vmatpush3.bf16.msra.mxu0 (!%p174_p10), %v829_v3  ;;  %762 = vmatpush3.bf16.msra.mxu1 (!%p174_p10), %v829_v3 }
  0x15   : > { %717 = vmatprep.subr.bf16.mxu0 (!%p174_p10), %v830_v4  ;;  %755 = vmatprep.subr.bf16.mxu1 (!%p174_p10), %v830_v4 }
  0x16   : > { %s1150_s28 = smov (!%p206_p11, %s639_s28), 15 }
  0x17   : > { %s680_s26 = sshll.u32 %s1150_s28, 3 }
  0x18   : > { %718 = vmatpush3.bf16.msra.mxu0 %v831_v5  ;;  %763 = vmatpush3.bf16.msra.mxu1 %v831_v5  ;;  %s1043_s5 = scalar_lea.vmem %s1136_s0, %s680_s26 }
  0x19   : > { %719 = vmatprep.subr.bf16.mxu0 %v832_v6  ;;  %756 = vmatprep.subr.bf16.mxu1 %v832_v6  ;;  %v844_v11 = vld [vmem:[%s1043_s5 + $0x4] ss:$8 sps:$4 sm:$0xff]   ;;  %v842_v18 = vld [vmem:[%s1043_s5] ss:$8 sps:$4 sm:$0xff]   ;;  %v848_v20 = vld [vmem:[%s1043_s5 + $0x14] ss:$8 sps:$4 sm:$0xff]  }
  0x1a   : > { %v847_v12 = vld [vmem:[%s1043_s5 + $0x24] ss:$8 sps:$4 sm:$0xff]   ;;  %436 = vmatprep.mubr.bf16.mxu0 %v844_v11  ;;  %v845_v19 = vld [vmem:[%s1043_s5 + $0x20] ss:$8 sps:$4 sm:$0xff]   ;;  %v850_v21 = vld [vmem:[%s1043_s5 + $0x34] ss:$8 sps:$4 sm:$0xff]  }
  0x1b   : > { %452 = vmatprep.mubr.bf16.mxu1 %v847_v12  ;;  %v852_v22 = vld [vmem:[%s1043_s5 + $0x10] ss:$8 sps:$4 sm:$0xff]  }
  0x1c   : > { %720 = vmatpush3.bf16.msra.mxu0 %v833_v7  ;;  %764 = vmatpush3.bf16.msra.mxu1 %v833_v7  ;;  %v853_v23 = vld [vmem:[%s1043_s5 + $0x30] ss:$8 sps:$4 sm:$0xff]   ;;  %s638_s5 = sshll.u32 %s202_s6, 5 }
  0x1d   : > { %721 = vmatprep.subr.bf16.mxu0 %v834_v8  ;;  %757 = vmatprep.subr.bf16.mxu1 %v834_v8  ;;  %s204_s7 = scalar_lea.vmem [#allocation2], %s638_s5 }
  0x1e   : > { %s532_s28 = sshll.u32 %s204_s7, 4  ;;  %s1086_s28 = int_to_ptr.vmem [resolvable:$true] %s532_s28 }
  0x1f   : > { %s854_s18 = scalar_lea.vmem %s1086_s28, 512  ;;  %p861_p1 = scmp.lt.s32.totalorder %s1086_s28, %s859_s21 }
  0x20   : > { %722 = vmatpush3.bf16.msra.mxu0 %v835_v9  ;;  %765 = vmatpush3.bf16.msra.mxu1 %v835_v9  ;;  %p855_p12 = scmp.ne.s32.totalorder %s1086_s28, %s854_s18  ;;  %p862_p2 = scmp.lt.s32.totalorder %s860_s23, %s854_s18 }
  0x21   : > { %723 = vmatprep.subr.bf16.mxu0 %v836_v10  ;;  %758 = vmatprep.subr.bf16.mxu1 %v836_v10 }
  0x22   : > { %p856_p13 = pnand %p855_p12, %p997_p4  ;;  %p863_p3 = por %p862_p2, %p861_p1 }
  0x24   : > { %724 = vmatpush3.bf16.msra.mxu0 %v837_v13  ;;  %766 = vmatpush3.bf16.msra.mxu1 %v837_v13  ;;  %p857_p0 = pneg %p856_p13 }
  0x25   : > { %725 = vmatprep.subr.bf16.mxu0 %v838_v14  ;;  %759 = vmatprep.subr.bf16.mxu1 %v838_v14 }
  0x26   : > { %p864_p5 = pnand %p863_p3, %p857_p0 }
  0x28   : > { %726 = vmatpush3.bf16.msra.mxu0 %v839_v15  ;;  %767 = vmatpush3.bf16.msra.mxu1 %v839_v15 }
  0x29   : > { %727 = vmatprep.subr.bf16.mxu0 %v840_v16  ;;  %760 = vmatprep.subr.bf16.mxu1 %v840_v16 }
  0x2c   : > { %728 = vmatpush3.bf16.msra.mxu0 %v841_v17  ;;  %768 = vmatpush3.bf16.msra.mxu1 %v841_v17 }
  0x2f   : > { %437 = vmatmul.mubr.bf16.vlgmr.msra.gmra.mrb[0].mxu0 %v842_v18  ;;  %453 = vmatmul.mubr.bf16.vlgmr.msra.gmra.mrb[0].mxu1 %v845_v19 }
  0x30   : > { %444 = vmatprep.mubr.bf16.mxu0 %v848_v20  ;;  %460 = vmatprep.mubr.bf16.mxu1 %v850_v21 }
  0x37   : > { %445 = vmatmul.mubr.bf16.gmra.mrb[4].mxu0 %v852_v22  ;;  %461 = vmatmul.mubr.bf16.gmra.mrb[4].mxu1 %v853_v23 }
 0x102   : > { %v729_v24 = vpop.f32.mrb[0].mxu0  ;;  %v741_v25 = vpop.f32.mrb[0].mxu1 }
 0x103   : > { %v730_v27 = vpop.f32.mrb[1].mxu0  ;;  %v742_v28 = vpop.f32.mrb[1].mxu1 }
 0x104   : > { %v731_v29 = vadd.f32 %v730_v27, %v729_v24  ;;  %v743_v30 = vadd.f32 %v742_v28, %v741_v25  ;;  %v732_v31 = vpop.f32.mrb[2].mxu0  ;;  %v744_v32 = vpop.f32.mrb[2].mxu1 }
 0x105   : > { %v733_v33 = vpop.f32.mrb[3].mxu0  ;;  %v745_v34 = vpop.f32.mrb[3].mxu1 }
 0x106   : > { %v439_v35 = vadd.f32 %v731_v29, %v642_v26  ;;  %v455_v36 = vadd.f32 %v743_v30, %v642_v26  ;;  %v734_v37 = vadd.f32 %v733_v33, %v732_v31  ;;  %v746_v38 = vadd.f32 %v745_v34, %v744_v32 }
 0x108   : > { %v442_v39 = vadd.f32 %v734_v37, %v642_v26  ;;  %v458_v40 = vadd.f32 %v746_v38, %v642_v26  ;;  %v469_v41 = vmax.f32 %v439_v35, 0.0  ;;  %v473_v42 = vmax.f32 %v455_v36, 0.0 }
 0x10a   : > { %v470_v43 = vmax.f32 %v442_v39, 0.0  ;;  %v474_v44 = vmax.f32 %v458_v40, 0.0  ;;  %v735_v45 = vpop.f32.mrb[4].mxu0  ;;  %v747_v46 = vpop.f32.mrb[4].mxu1 }
 0x10b   : > { %v736_v47 = vpop.f32.mrb[5].mxu0  ;;  %v748_v48 = vpop.f32.mrb[5].mxu1 }
 0x10c   : > { %v693_v49 = vpack.c.bf16 %v470_v43, %v469_v41  ;;  %v703_v50 = vpack.c.bf16 %v474_v44, %v473_v42  ;;  %v737_v51 = vadd.f32 %v736_v47, %v735_v45  ;;  %v749_v52 = vadd.f32 %v748_v48, %v747_v46  ;;  %v738_v53 = vpop.f32.mrb[6].mxu0  ;;  %v750_v54 = vpop.f32.mrb[6].mxu1 }
 0x10d   : > { %v739_v55 = vpop.f32.mrb[7].mxu0  ;;  %v751_v56 = vpop.f32.mrb[7].mxu1 }
 0x10e   : > { %694 = vst [vmem:[%s204_s7] sm:$0xff] %v693_v49   ;;  %711 = vst [vmem:[%s204_s7 + $0x10] sm:$0xff] %v703_v50   ;;  %v447_v57 = vadd.f32 %v737_v51, %v642_v26  ;;  %v463_v58 = vadd.f32 %v749_v52, %v642_v26  ;;  %v740_v59 = vadd.f32 %v739_v55, %v738_v53 }
 0x10f   : > { %v752_v60 = vadd.f32 %v751_v56, %v750_v54 }
 0x110   : > { %v450_v61 = vadd.f32 %v740_v59, %v642_v26  ;;  %v471_v63 = vmax.f32 %v447_v57, 0.0  ;;  %v475_v0 = vmax.f32 %v463_v58, 0.0 }
 0x111   : > { %v466_v62 = vadd.f32 %v752_v60, %v642_v26 }
 0x112   : > { %v472_v1 = vmax.f32 %v450_v61, 0.0 }
 0x113   : > { %v476_v2 = vmax.f32 %v466_v62, 0.0 }
 0x114   : > { %v698_v3 = vpack.c.bf16 %v472_v1, %v471_v63 }
 0x115   : > { %v708_v4 = vpack.c.bf16 %v476_v2, %v475_v0 }
 0x116   : > { %710 = vst [vmem:[%s204_s7 + $0x8] sm:$0xff] %v698_v3  }
 0x117   : > { %712 = vst [vmem:[%s204_s7 + $0x18] sm:$0xff] %v708_v4  }
 0x118   : > { %867 = shalt.err (!%p864_p5)
}
 0x119   : > { %s868_s26 = scalar_lea.hbm %s1084_s11, 512  ;;  %s872_s30 = scalar_lea.hbm %s1139_s3, 1024 }
 0x11a   : > { %p869_p6 = scmp.ne.s32.totalorder %s1084_s11, %s868_s26  ;;  %p873_p10 = scmp.lt.u32.totalorder %s1084_s11, %s1139_s3 }
 0x11b   : > { %p874_p11 = scmp.lt.u32.totalorder %s872_s30, %s868_s26  ;;  %p876_p13 = scmp.lt.u32.totalorder %s868_s26, %s1084_s11 }
 0x11c   : > { %p870_p7 = pnand %p869_p6, %p997_p4 }
 0x11d   : > { %p875_p12 = por %p874_p11, %p873_p10 }
 0x11e   : > { %p871_p9 = pneg %p870_p7 }
 0x11f   : > { %p877_p0 = por %p876_p13, %p875_p12 }
 0x121   : > { %p878_p1 = pnand %p877_p0, %p871_p9 }
 0x123   : > { %881 = shalt.err (!%p878_p1)
}
 0x124   : > { %s935_s5 = smov 64   ;;  %s936_s7 = smov 4  }
 0x125   : > { %769 = dma.vmem_to_hbm [thread:$0]  (%p997_p4), %s1086_s28, 512, %s1084_s11, %s1090_s15, %s935_s5, %s935_s5, %s936_s7  }
 0x126 PF: > { %p775_p2 = scmp.ge.s32.totalorder %s932_s17, 2  ;;  %s547_s8 = sand.u32 1, %s912_s12  }
 0x127   : > { %s548_s9 = scalar_lea.sflag [#allocation3], %s547_s8 }
 0x128   : > { %p772_p3 = pnand %p775_p2, %p1004_p8 }
 0x12a   : > { %907 = dma.done.wait (!%p772_p3), %s548_s9, 512  }
 0x12b   : > { %909 = vsyncadd (!%p772_p3), %s548_s9, 4294966784  ;;  %s16_s17 = sadd.s32 1, %s932_s17   ;;  %s1142_s12 = smov %s916_s13 }
 0x12c   : > { %p13_p5 = scmp.ge.s32.totalorder %s16_s17, 4   ;;  %s1143_s13 = smov %s920_s14 }
 0x12d   : > { %s1144_s14 = smov %s1010_s25  ;;  %s1145_s15 = smov %s928_s16 }
 0x12e   : > { %s1146_s16 = smov %s1148_s20  ;;  %15 = sbr.rel (!%p13_p5) target bundleno = 4 (0x4), region = 73 }
 0x135   :  { %553 = vsyncpa [#allocation3], 1 }
 0x136   :  { %555 = vsyncpa [#allocation3 + $0x1], 1 }

</bundles_post_ra>
